<compile_context>
chip_gen: v7x
topology: tpu7x:2x2x1
jax: 0.10.0
libtpu: 0.0.40
codegen_flags: <defaults>
</compile_context>

<pallas_src>
import functools

import jax
import jax.numpy as jnp
from jax.experimental import pallas as pl
from jax.experimental.pallas import tpu as pltpu


# --------------------------------------------------------------------------- #
# Kernel
# --------------------------------------------------------------------------- #
def _distmtx_kernel(q_ref, a_ref, u_ref, w_ref, bias_ref, out_ref, *,
                    mxu_dtype, approx_recip):
    q = q_ref[...]                                  # (Bb, La, D) f32  == embed_a block
    a = a_ref[...]                                  # (Bb, Lb, D) f32  == embed_b block
    Bb, La, D = q.shape
    Lb = a.shape[1]
    C = w_ref.shape[0]

    q_m = q.astype(mxu_dtype)
    a_m = a.astype(mxu_dtype)
    u_m = u_ref[...].astype(mxu_dtype)

    # ---- G = tanh((Q @ U) @ A^T): low-precision MXU operands, f32 accumulation
    qu = jnp.dot(q_m.reshape(Bb * La, D), u_m,
                 preferred_element_type=jnp.float32).reshape(Bb, La, D)
    g = jnp.tanh(jnp.einsum('ble,bme->blm', qu.astype(mxu_dtype), a_m,
                            preferred_element_type=jnp.float32))   # (Bb, La, Lb) f32

    # ---- row / column max pooling + masked softmax (all f32 VPU/EUP work) ----
    def _masked_softmax(x):
        x = jnp.where(x == 0.0, -1e9, x)            # masked_fill(g == 0, -1e9)
        m = jnp.max(x, axis=-1, keepdims=True)
        e = jnp.exp(x - m)
        denom = jnp.sum(e, axis=-1, keepdims=True)
        if approx_recip:
            return e * pl.reciprocal(denom, approx=True)   # EUP vrcp: ~free
        return e / denom

    sigma_q = _masked_softmax(jnp.max(g, axis=2))   # (Bb, La)
    sigma_a = _masked_softmax(jnp.max(g, axis=1))   # (Bb, Lb)

    a_vec = q * sigma_q[:, :, None]                 # (Bb, La, D) f32
    b_vec = a * sigma_a[:, :, None]                 # (Bb, Lb, D) f32

    # ---- collapse the class dim into the M side of ONE MXU matmul -----------
    #   aw[b, c*La + i, d] = a_vec[b, i, d] * W[c, d]
    aw = jnp.concatenate([a_vec * w_ref[c] for c in range(C)], axis=1)   # (Bb, C*La, D)
    logits = jnp.einsum('bkd,bjd->bkj',
                        aw.astype(mxu_dtype), b_vec.astype(mxu_dtype),
                        preferred_element_type=jnp.float32)              # (Bb, C*La, Lb)
    logits = logits.reshape(Bb, C, La, Lb)

    # ---- + bias[c], built so the epilogue stays a single contiguous store ----
    bias_b = jnp.concatenate(
        [jnp.full((Bb, 1, La, Lb), bias_ref[c], jnp.float32) for c in range(C)],
        axis=1)                                                           # (Bb, C, La, Lb)
    out_ref[...] = (logits + bias_b).astype(out_ref.dtype)


# --------------------------------------------------------------------------- #
# Tiling / VMEM heuristics
# --------------------------------------------------------------------------- #
def _vmem_capacity_bytes():
    cap = None
    try:
        info = pltpu.get_tpu_info()
        cap = getattr(info, "vmem_capacity_bytes", None)
    except Exception:
        cap = None
    if not cap or cap <= 0:
        cap = 64 * 1024 * 1024          # conservative default: v7x per-core VMEM
    return int(cap)


def _num_tensorcores():
    try:
        info = pltpu.get_tpu_info()
        for name in ("num_cores", "core_count", "num_tensorcores", "tensorcore_count"):
            v = getattr(info, name, None)
            if isinstance(v, int) and v > 0:
                return int(v)
    except Exception:
        pass
    return 1


def _per_batch_vmem_bytes(La, Lb, D, C, out_itemsize):
    """Conservative f32/bf16 working-set estimate per batch element."""
    io = 2 * 4 * (La + Lb) * D + 2 * out_itemsize * C * La * Lb        # double-buffered blocks
    mid = (4 * (La * Lb + 2 * (La + Lb) * D + C * La * D + 3 * C * La * Lb)
           + 2 * ((La + Lb) * D + C * La * D + Lb * D))                # f32 temps + bf16 copies
    return io + mid


def _choose_tiling(B, La, Lb, D, C, out_itemsize, batch_block=None):
    cap = _vmem_capacity_bytes()
    vmem_limit = int(min(cap * 9 // 10, 100 * 1024 * 1024))
    if batch_block is not None:
        block = max(1, min(int(batch_block), B))
        return block, pl.cdiv(B, block), vmem_limit

    # ~48 MiB working-set budget on 128 MiB parts (v5e/v6e), ~32 MiB on v7x.
    budget = min(cap // 2, 48 * 1024 * 1024)
    per_b = max(1, _per_batch_vmem_bytes(La, Lb, D, C, out_itemsize))
    block = max(1, min(B, budget // per_b))
    grid = pl.cdiv(B, block)

    # Multi-TensorCore (v7x megacore): keep the parallel grid even so both
    # cores get work.  Single-core parts keep the largest block (no shrink).
    if _num_tensorcores() >= 2 and B >= 2:
        grid = max(grid, 2)
        if grid % 2:
            grid += 1
        block = max(1, pl.cdiv(B, grid))
        grid = pl.cdiv(B, block)
    return block, grid, vmem_limit


# --------------------------------------------------------------------------- #
# Wrapper (== distMtx_core_module.forward)
# --------------------------------------------------------------------------- #
def distmtx_forward(embed_a, embed_b, U, W, bias, *, batch_block=None,
                    mxu_dtype=jnp.bfloat16, out_dtype=jnp.float32,
                    approx_recip=True, channels_last=True):
    """logits = Linear(a_vec[:, :, None, :] * b_vec[:, None, :, :]).

    channels_last=True  -> (B, La, Lb, C)  (module layout, extra HBM transpose)
    channels_last=False -> (B, C, La, Lb)  (kernel-native lane-dense layout)
    """
    B, La, D = embed_a.shape
    B2, Lb, D2 = embed_b.shape
    C, D3 = W.shape
    assert B2 == B and D2 == D and D3 == D
    assert U.shape == (D, D) and bias.shape == (C,)

    # Keep the larger of (La, Lb) on the lane/N side of the MXU matmuls and of
    # the stored output block; also makes (Q@U)@A^T the cheaper contraction
    # order.  Uses the identity G(A, Q, U^T) = G(Q, A, U)^T.
    if La > Lb:
        out = distmtx_forward(embed_b, embed_a, jnp.transpose(U), W, bias,
                              batch_block=batch_block, mxu_dtype=mxu_dtype,
                              out_dtype=out_dtype, approx_recip=approx_recip,
                              channels_last=False)            # (B, C, Lb, La)
        out = jnp.swapaxes(out, 2, 3)                          # (B, C, La, Lb)
        return jnp.transpose(out, (0, 2, 3, 1)) if channels_last else out

    out_itemsize = jnp.dtype(out_dtype).itemsize
    batch_block, grid_n, vmem_limit = _choose_tiling(
        B, La, Lb, D, C, out_itemsize, batch_block)
    B_pad = grid_n * batch_block

    qa, ab = embed_a, embed_b
    if B_pad != B:                                  # pad instead of divisor search
        pad = B_pad - B
        qa = jnp.pad(qa, ((0, pad), (0, 0), (0, 0)))
        ab = jnp.pad(ab, ((0, pad), (0, 0), (0, 0)))

    flops = 2 * B_pad * (La * D * D + La * Lb * D + C * La * Lb * D)
    transcendentals = B_pad * (La * Lb + La + Lb)
    bytes_accessed = (4 * B_pad * (La + Lb) * D
                      + out_itemsize * B_pad * C * La * Lb
                      + 4 * (D * D + C * D + C))

    kernel = functools.partial(_distmtx_kernel, mxu_dtype=mxu_dtype,
                               approx_recip=approx_recip)

    out_cf = pl.pallas_call(
        kernel,
        out_shape=jax.ShapeDtypeStruct((B_pad, C, La, Lb), out_dtype),
        grid_spec=pltpu.PrefetchScalarGridSpec(
            num_scalar_prefetch=0,
            grid=(grid_n,),
            in_specs=[
                pl.BlockSpec((batch_block, La, D), lambda i: (i, 0, 0)),   # embed_a
                pl.BlockSpec((batch_block, Lb, D), lambda i: (i, 0, 0)),   # embed_b
                pl.BlockSpec((D, D), lambda i: (0, 0)),                    # U (resident)
                pl.BlockSpec((C, D), lambda i: (0, 0)),                    # ffn weight (resident)
                pl.BlockSpec(memory_space=pltpu.MemorySpace.SMEM),         # ffn bias
            ],
            out_specs=pl.BlockSpec((batch_block, C, La, Lb),
                                   lambda i: (i, 0, 0, 0)),
        ),
        compiler_params=pltpu.CompilerParams(
            dimension_semantics=("parallel",),
            vmem_limit_bytes=vmem_limit),
        cost_estimate=pl.CostEstimate(flops=flops,
                                      transcendentals=transcendentals,
                                      bytes_accessed=bytes_accessed),
    )(qa, ab, U, W, bias)

    if B_pad != B:
        out_cf = out_cf[:B]
    if channels_last:
        # Module layout (B, La, Lb, C).  For fused consumers pass
        # channels_last=False to avoid this extra HBM read+write pass.
        return jnp.transpose(out_cf, (0, 2, 3, 1))
    return out_cf


# --------------------------------------------------------------------------- #
# Pure-JAX reference (replica of distMtx_core_module.forward, attentive-pool)
# --------------------------------------------------------------------------- #
def _reference(embed_a, embed_b, U, W, bias):
    Q, A = embed_a, embed_b
    G = jnp.tanh(jnp.einsum('ble,bme->blm', jnp.einsum('bld,de->ble', Q, U), A))
    g_q = jnp.max(G, axis=2)
    g_a = jnp.max(G, axis=1)

    def att(g, X):
        g = jnp.where(g == 0.0, -1e9, g)
        s = jax.nn.softmax(g, axis=-1)
        return X * s[:, :, None]

    a_vec = att(g_q, Q)
    b_vec = att(g_a, A)
    feat = a_vec[:, :, None, :] * b_vec[:, None, :, :]
    return jnp.einsum('bijd,cd->bijc', feat, W) + bias[None, None, None, :]


# --------------------------------------------------------------------------- #
if __name__ == "__main__":
    # Small shapes consistent with the module defaults (dim=20, num_class=3).
    B, La, Lb, D, C = 4, 8, 16, 20, 3

    key = jax.random.PRNGKey(0)
    k1, k2, k3, k4, k5 = jax.random.split(key, 5)
    embed_a = jax.random.normal(k1, (B, La, D), dtype=jnp.float32)
    embed_b = jax.random.normal(k2, (B, Lb, D), dtype=jnp.float32)
    # PyTorch init of U is zeros (degenerate: tanh(0)=0 -> all masked); use a
    # deterministic random init so the kernel math is exercised non-trivially.
    U = 0.1 * jax.random.normal(k3, (D, D), dtype=jnp.float32)
    W = 0.1 * jax.random.normal(k4, (C, D), dtype=jnp.float32)   # Linear weight (C, D)
    bias = 0.1 * jax.random.normal(k5, (C,), dtype=jnp.float32)  # Linear bias (C,)

    ref = _reference(embed_a, embed_b, U, W, bias)

    # 1) f32 MXU operands + exact softmax reciprocal: tight parity check.
    f_exact = jax.jit(functools.partial(distmtx_forward,
                                        mxu_dtype=jnp.float32,
                                        approx_recip=False))
    out_exact = jax.block_until_ready(f_exact(embed_a, embed_b, U, W, bias))
    assert out_exact.shape == (B, La, Lb, C), out_exact.shape
    assert jnp.allclose(out_exact, ref, atol=3e-3, rtol=3e-3), \
        float(jnp.max(jnp.abs(out_exact - ref)))

    # 2) Default fast path: bf16 MXU operands + EUP approx reciprocal.
    f_fast = jax.jit(distmtx_forward)
    out_fast = jax.block_until_ready(f_fast(embed_a, embed_b, U, W, bias))
    assert out_fast.shape == (B, La, Lb, C), out_fast.shape
    assert jnp.allclose(out_fast, ref, atol=6e-2, rtol=6e-2), \
        float(jnp.max(jnp.abs(out_fast - ref)))

    # 3) Ragged batch (B=3) with a forced block of 2 (exercises padding) and
    #    swapped sequence lengths (exercises the La > Lb lane-orientation path).
    B3 = 3
    ea3 = embed_b[:B3]        # (3, 16, 20)  -> La = 16
    eb3 = embed_a[:B3]        # (3,  8, 20)  -> Lb = 8   (La > Lb)
    ref3 = _reference(ea3, eb3, U, W, bias)
    f3 = jax.jit(functools.partial(distmtx_forward, mxu_dtype=jnp.float32,
                                   approx_recip=False, batch_block=2))
    out3 = jax.block_until_ready(f3(ea3, eb3, U, W, bias))
    assert out3.shape == (B3, Lb, La, C), out3.shape
    assert jnp.allclose(out3, ref3, atol=3e-3, rtol=3e-3), \
        float(jnp.max(jnp.abs(out3 - ref3)))

    print("KERNEL_OK")
</pallas_src>

<mosaic_0001>
module attributes {stable_mosaic.version = 11 : i64} {
  func.func @_distmtx_kernel(%arg0: i32, %arg1: memref<4x8x20xf32, #tpu.memory_space<vmem>>, %arg2: memref<4x16x20xf32, #tpu.memory_space<vmem>>, %arg3: memref<20x20xf32, #tpu.memory_space<vmem>>, %arg4: memref<3x20xf32, #tpu.memory_space<vmem>>, %arg5: memref<3xf32, #tpu.memory_space<smem>>, %arg6: memref<4x3x8x16xf32, #tpu.memory_space<vmem>>) attributes {dimension_semantics = [#tpu.dimension_semantics<parallel>], iteration_bounds = array<i64: 1>, scalar_prefetch = 0 : i64, scratch_operands = 0 : i64, tpu.core_type = #tpu.core_type<tc>, window_params = [{transform_indices = @transform_0, window_bounds = array<i64: 4, 8, 20>}, {transform_indices = @transform_1, window_bounds = array<i64: 4, 16, 20>}, {pipeline_mode = #tpu.pipeline_mode<synchronous>, transform_indices = @transform_2, window_bounds = array<i64: 20, 20>}, {pipeline_mode = #tpu.pipeline_mode<synchronous>, transform_indices = @transform_3, window_bounds = array<i64: 3, 20>}, {transform_indices = @transform_4, window_bounds = array<i64: 3>}, {transform_indices = @transform_5, window_bounds = array<i64: 4, 3, 8, 16>}]} {
    %c0 = arith.constant 0 : index
    %c0_0 = arith.constant 0 : index
    %c0_1 = arith.constant 0 : index
    %0 = vector.load %arg1[%c0, %c0_0, %c0_1] : memref<4x8x20xf32, #tpu.memory_space<vmem>>, vector<4x8x20xf32>
    %c0_2 = arith.constant 0 : index
    %c0_3 = arith.constant 0 : index
    %c0_4 = arith.constant 0 : index
    %1 = vector.load %arg2[%c0_2, %c0_3, %c0_4] : memref<4x16x20xf32, #tpu.memory_space<vmem>>, vector<4x16x20xf32>
    %c0_5 = arith.constant 0 : index
    %c0_6 = arith.constant 0 : index
    %2 = vector.load %arg3[%c0_5, %c0_6] : memref<20x20xf32, #tpu.memory_space<vmem>>, vector<20x20xf32>
    %3 = vector.shape_cast %0 : vector<4x8x20xf32> to vector<32x20xf32>
    %cst = arith.constant dense<0.000000e+00> : vector<32x20xf32>
    %4 = tpu.matmul %3, %2, %cst {dimension_numbers = #tpu.dot_dimension_numbers<[1], [0], [0], [1], [0, 0, 1, 1], [], []>} : vector<32x20xf32>, vector<20x20xf32>, vector<32x20xf32> -> vector<32x20xf32>
    %5 = vector.shape_cast %4 : vector<32x20xf32> to vector<4x8x20xf32>
    "tpu.trace_start"() <{level = 10 : i32, message = "ble,bme->blm"}> : () -> ()
    %cst_7 = arith.constant dense<0.000000e+00> : vector<4x8x16xf32>
    %6 = tpu.matmul %5, %1, %cst_7 {dimension_numbers = #tpu.dot_dimension_numbers<[2], [2], [1], [1], [0, 0, 0, 1, 1, 1], [0], [0]>} : vector<4x8x20xf32>, vector<4x16x20xf32>, vector<4x8x16xf32> -> vector<4x8x16xf32>
    "tpu.trace_stop"() : () -> ()
    %7 = math.tanh %6 : vector<4x8x16xf32>
    %cst_8 = arith.constant dense<0xFF800000> : vector<4x8xf32>
    %8 = vector.multi_reduction <maximumf>, %7, %cst_8 [2] : vector<4x8x16xf32> to vector<4x8xf32>
    %cst_9 = arith.constant 0.000000e+00 : f32
    %9 = vector.broadcast %cst_9 : f32 to vector<4x8xf32>
    %10 = arith.cmpf oeq, %8, %9 : vector<4x8xf32>
    %cst_10 = arith.constant -1.000000e+09 : f32
    %11 = vector.broadcast %cst_10 : f32 to vector<4x8xf32>
    %12 = arith.select %10, %11, %8 : vector<4x8xi1>, vector<4x8xf32>
    %cst_11 = arith.constant dense<0xFF800000> : vector<4xf32>
    %13 = vector.multi_reduction <maximumf>, %12, %cst_11 [1] : vector<4x8xf32> to vector<4xf32>
    %14 = vector.shape_cast %13 : vector<4xf32> to vector<4x1xf32>
    %15 = vector.broadcast %14 : vector<4x1xf32> to vector<4x8xf32>
    %16 = arith.subf %12, %15 : vector<4x8xf32>
    %17 = math.exp %16 : vector<4x8xf32>
    %cst_12 = arith.constant dense<0.000000e+00> : vector<4xf32>
    %18 = vector.multi_reduction <add>, %17, %cst_12 [1] : vector<4x8xf32> to vector<4xf32>
    %19 = vector.shape_cast %18 : vector<4xf32> to vector<4x1xf32>
    %20 = vector.broadcast %19 : vector<4x1xf32> to vector<4x8xf32>
    %21 = arith.divf %17, %20 : vector<4x8xf32>
    %cst_13 = arith.constant dense<0xFF800000> : vector<4x16xf32>
    %22 = vector.multi_reduction <maximumf>, %7, %cst_13 [1] : vector<4x8x16xf32> to vector<4x16xf32>
    %cst_14 = arith.constant 0.000000e+00 : f32
    %23 = vector.broadcast %cst_14 : f32 to vector<4x16xf32>
    %24 = arith.cmpf oeq, %22, %23 : vector<4x16xf32>
    %cst_15 = arith.constant -1.000000e+09 : f32
    %25 = vector.broadcast %cst_15 : f32 to vector<4x16xf32>
    %26 = arith.select %24, %25, %22 : vector<4x16xi1>, vector<4x16xf32>
    %cst_16 = arith.constant dense<0xFF800000> : vector<4xf32>
    %27 = vector.multi_reduction <maximumf>, %26, %cst_16 [1] : vector<4x16xf32> to vector<4xf32>
    %28 = vector.shape_cast %27 : vector<4xf32> to vector<4x1xf32>
    %29 = vector.broadcast %28 : vector<4x1xf32> to vector<4x16xf32>
    %30 = arith.subf %26, %29 : vector<4x16xf32>
    %31 = math.exp %30 : vector<4x16xf32>
    %cst_17 = arith.constant dense<0.000000e+00> : vector<4xf32>
    %32 = vector.multi_reduction <add>, %31, %cst_17 [1] : vector<4x16xf32> to vector<4xf32>
    %33 = vector.shape_cast %32 : vector<4xf32> to vector<4x1xf32>
    %34 = vector.broadcast %33 : vector<4x1xf32> to vector<4x16xf32>
    %35 = arith.divf %31, %34 : vector<4x16xf32>
    %36 = vector.shape_cast %21 : vector<4x8xf32> to vector<4x8x1xf32>
    %37 = vector.broadcast %36 : vector<4x8x1xf32> to vector<4x8x20xf32>
    %38 = arith.mulf %0, %37 : vector<4x8x20xf32>
    %39 = vector.shape_cast %35 : vector<4x16xf32> to vector<4x16x1xf32>
    %40 = vector.broadcast %39 : vector<4x16x1xf32> to vector<4x16x20xf32>
    %41 = arith.mulf %1, %40 : vector<4x16x20xf32>
    %c0_18 = arith.constant 0 : index
    %c0_19 = arith.constant 0 : index
    %42 = vector.load %arg4[%c0_18, %c0_19] : memref<3x20xf32, #tpu.memory_space<vmem>>, vector<1x20xf32>
    %43 = vector.shape_cast %42 : vector<1x20xf32> to vector<20xf32>
    %44 = vector.shape_cast %43 : vector<20xf32> to vector<1x1x20xf32>
    %45 = vector.broadcast %44 : vector<1x1x20xf32> to vector<4x8x20xf32>
    %46 = arith.mulf %38, %45 : vector<4x8x20xf32>
    %c1 = arith.constant 1 : index
    %c0_20 = arith.constant 0 : index
    %47 = vector.load %arg4[%c1, %c0_20] : memref<3x20xf32, #tpu.memory_space<vmem>>, vector<1x20xf32>
    %48 = vector.shape_cast %47 : vector<1x20xf32> to vector<20xf32>
    %49 = vector.shape_cast %48 : vector<20xf32> to vector<1x1x20xf32>
    %50 = vector.broadcast %49 : vector<1x1x20xf32> to vector<4x8x20xf32>
    %51 = arith.mulf %38, %50 : vector<4x8x20xf32>
    %c2 = arith.constant 2 : index
    %c0_21 = arith.constant 0 : index
    %52 = vector.load %arg4[%c2, %c0_21] : memref<3x20xf32, #tpu.memory_space<vmem>>, vector<1x20xf32>
    %53 = vector.shape_cast %52 : vector<1x20xf32> to vector<20xf32>
    %54 = vector.shape_cast %53 : vector<20xf32> to vector<1x1x20xf32>
    %55 = vector.broadcast %54 : vector<1x1x20xf32> to vector<4x8x20xf32>
    %56 = arith.mulf %38, %55 : vector<4x8x20xf32>
    %57 = tpu.concatenate %46, %51, %56 in 1 : vector<4x8x20xf32>, vector<4x8x20xf32>, vector<4x8x20xf32> -> vector<4x24x20xf32>
    "tpu.trace_start"() <{level = 10 : i32, message = "bkd,bjd->bkj"}> : () -> ()
    %cst_22 = arith.constant dense<0.000000e+00> : vector<4x24x16xf32>
    %58 = tpu.matmul %57, %41, %cst_22 {dimension_numbers = #tpu.dot_dimension_numbers<[2], [2], [1], [1], [0, 0, 0, 1, 1, 1], [0], [0]>} : vector<4x24x20xf32>, vector<4x16x20xf32>, vector<4x24x16xf32> -> vector<4x24x16xf32>
    "tpu.trace_stop"() : () -> ()
    %59 = vector.shape_cast %58 : vector<4x24x16xf32> to vector<4x3x8x16xf32>
    %c0_23 = arith.constant 0 : index
    %60 = memref.load %arg5[%c0_23] : memref<3xf32, #tpu.memory_space<smem>>
    %61 = vector.broadcast %60 : f32 to vector<4x1x8x16xf32>
    %c1_24 = arith.constant 1 : index
    %62 = memref.load %arg5[%c1_24] : memref<3xf32, #tpu.memory_space<smem>>
    %63 = vector.broadcast %62 : f32 to vector<4x1x8x16xf32>
    %c2_25 = arith.constant 2 : index
    %64 = memref.load %arg5[%c2_25] : memref<3xf32, #tpu.memory_space<smem>>
    %65 = vector.broadcast %64 : f32 to vector<4x1x8x16xf32>
    %66 = tpu.concatenate %61, %63, %65 in 1 : vector<4x1x8x16xf32>, vector<4x1x8x16xf32>, vector<4x1x8x16xf32> -> vector<4x3x8x16xf32>
    %67 = arith.addf %59, %66 : vector<4x3x8x16xf32>
    %c0_26 = arith.constant 0 : index
    %c0_27 = arith.constant 0 : index
    %c0_28 = arith.constant 0 : index
    %c0_29 = arith.constant 0 : index
    %68 = vector.load %arg6[%c0_26, %c0_27, %c0_28, %c0_29] : memref<4x3x8x16xf32, #tpu.memory_space<vmem>>, vector<4x3x8x16xf32>
    tpu.vector_store %arg6[%c0_26, %c0_27, %c0_28, %c0_29], %67 {strides = array<i32>} : memref<4x3x8x16xf32, #tpu.memory_space<vmem>>, vector<4x3x8x16xf32>,
    return
  }
  func.func @transform_0(%arg0: i32) -> (i32, i32, i32) {
    %c0_i32 = arith.constant 0 : i32
    %c0_i32_0 = arith.constant 0 : i32
    %c0_i32_1 = arith.constant 0 : i32
    return %arg0, %c0_i32, %c0_i32_0 : i32, i32, i32
  }
  func.func @transform_1(%arg0: i32) -> (i32, i32, i32) {
    %c0_i32 = arith.constant 0 : i32
    %c0_i32_0 = arith.constant 0 : i32
    %c0_i32_1 = arith.constant 0 : i32
    return %arg0, %c0_i32, %c0_i32_0 : i32, i32, i32
  }
  func.func @transform_2(%arg0: i32) -> (i32, i32) {
    %c0_i32 = arith.constant 0 : i32
    %c0_i32_0 = arith.constant 0 : i32
    %c0_i32_1 = arith.constant 0 : i32
    return %c0_i32, %c0_i32_0 : i32, i32
  }
  func.func @transform_3(%arg0: i32) -> (i32, i32) {
    %c0_i32 = arith.constant 0 : i32
    %c0_i32_0 = arith.constant 0 : i32
    %c0_i32_1 = arith.constant 0 : i32
    return %c0_i32, %c0_i32_0 : i32, i32
  }
  func.func @transform_4(%arg0: i32) -> i32 {
    %c0_i32 = arith.constant 0 : i32
    %c0_i32_0 = arith.constant 0 : i32
    return %c0_i32 : i32
  }
  func.func @transform_5(%arg0: i32) -> (i32, i32, i32, i32) {
    %c0_i32 = arith.constant 0 : i32
    %c0_i32_0 = arith.constant 0 : i32
    %c0_i32_1 = arith.constant 0 : i32
    %c0_i32_2 = arith.constant 0 : i32
    return %arg0, %c0_i32, %c0_i32_0, %c0_i32_1 : i32, i32, i32, i32
  }
}

</mosaic_0001>

<bundles_post_ra>
// kernel: distmtx_forward.1
= control target key start
LH: loop header
LB: loop body
LE: loop exit
PB: predicated region body
PF: predicated region fallthrough
CT: control target
= control target key end

     0   :  { %10 = vsyncpa [#allocation3], 0  ;;  %s2014_s0 = inlined_call_operand.hbm [shape: f32[4,8,20], index: 0, kind: input, shape index: {}]   ;;  %s2015_s1 = inlined_call_operand.hbm [shape: f32[4,16,20], index: 1, kind: input, shape index: {}]   ;;  %s2016_s2 = inlined_call_operand.hbm [shape: f32[20,20], index: 2, kind: input, shape index: {}]   ;;  %s2017_s3 = inlined_call_operand.vmem [shape: f32[3,20], index: 3, kind: input, shape index: {}]   ;;  %s2018_s4 = inlined_call_operand.vmem [shape: f32[3], index: 4, kind: input, shape index: {}]   ;;  %s2019_s5 = inlined_call_operand.hbm [shape: f32[4,3,8,16], index: 5, kind: output, shape index: {}]  }
   0x1   :  { %11 = vsyncpa [#allocation7], 0 }
   0x2   :  { %12 = vsyncpa [#allocation5], 0 }
   0x3   :  { %13 = vsyncpa [#allocation4], 0  ;;  %s1663_s18 = smov [#allocation6]   ;;  %s1664_s20 = smov [#allocation2]  }
   0x4   :  { %s31_s19 = sshll.u32 %s1663_s18, 4  ;;  %s19_s21 = sshll.u32 %s1664_s20, 4  ;;  %s32_s19 = int_to_ptr.vmem [resolvable:$true] %s31_s19  ;;  %s1704_s21 = int_to_ptr.vmem [resolvable:$true] %s19_s21 }
   0x5   :  { %s1555_s24 = scalar_lea.hbm %s2015_s1, 1024 }
   0x6   :  { %p1556_p0 = scmp.ne.s32.totalorder %s2015_s1, %s1555_s24  ;;  %p1559_p1 = scmp.lt.u32.totalorder %s1555_s24, %s2015_s1 }
   0x8   :  { %p1561_p2 = pnand %p1559_p1, %p1556_p0 }
   0xa   :  { %1564 = shalt.err (!%p1561_p2)
}
   0xb   :  { %s1565_s29 = scalar_lea.vmem %s32_s19, 1024  ;;  %p1570_p4 = scmp.lt.s32.totalorder %s32_s19, %s32_s19 }
   0xc   :  { %p1566_p3 = scmp.ne.s32.totalorder %s32_s19, %s1565_s29  ;;  %p1571_p5 = scmp.lt.s32.totalorder %s1565_s29, %s1565_s29 }
   0xe   :  { %p1572_p6 = por %p1571_p5, %p1570_p4 }
  0x10   :  { %p1573_p7 = pnand %p1572_p6, %p1566_p3 }
  0x12   :  { %1576 = shalt.err (!%p1573_p7)
}
  0x13   :  { %s1665_s30 = smov 128   ;;  %s1666_s6 = smov 8  }
  0x14   :  { %37 = dma.hbm_to_vmem [thread:$0]  %s2015_s1, 1024, %s32_s19, [#allocation7], %s1665_s30, %s1665_s30, %s1666_s6  }
  0x15   :  { %s1577_s11 = scalar_lea.hbm %s2014_s0, 512 }
  0x16   :  { %p1578_p8 = scmp.ne.s32.totalorder %s2014_s0, %s1577_s11  ;;  %p1581_p9 = scmp.lt.u32.totalorder %s1577_s11, %s2014_s0 }
  0x18   :  { %p1583_p10 = pnand %p1581_p9, %p1578_p8 }
  0x1a   :  { %1586 = shalt.err (!%p1583_p10)
}
  0x1b   :  { %s1587_s16 = scalar_lea.vmem %s1704_s21, 512  ;;  %p1592_p12 = scmp.lt.s32.totalorder %s1704_s21, %s1704_s21 }
  0x1c   :  { %p1588_p11 = scmp.ne.s32.totalorder %s1704_s21, %s1587_s16  ;;  %p1593_p13 = scmp.lt.s32.totalorder %s1587_s16, %s1587_s16 }
  0x1e   :  { %p1594_p0 = por %p1593_p13, %p1592_p12 }
  0x20   :  { %p1595_p1 = pnand %p1594_p0, %p1588_p11 }
  0x22   :  { %1598 = shalt.err (!%p1595_p1)
}
  0x23   :  { %25 = dma.hbm_to_vmem [thread:$0]  %s2014_s0, 512, %s1704_s21, [#allocation3], %s1665_s30, %s1665_s30, %s1666_s6  }
  0x24   :  { %s58_s20 = sshll.u32 %s2018_s4, 4  ;;  %s1667_s22 = smov [#allocation8]   ;;  %s59_s20 = int_to_ptr.vmem [resolvable:$true] %s58_s20 }
  0x25   :  { %s43_s23 = sshll.u32 %s1667_s22, 4  ;;  %s1599_s26 = scalar_lea.hbm %s2016_s2, 384  ;;  %s44_s23 = int_to_ptr.vmem [resolvable:$true] %s43_s23 }
  0x26   :  { %p1600_p2 = scmp.ne.s32.totalorder %s2016_s2, %s1599_s26  ;;  %p1603_p3 = scmp.lt.u32.totalorder %s1599_s26, %s2016_s2 }
  0x28   :  { %p1605_p4 = pnand %p1603_p3, %p1600_p2 }
  0x2a   :  { %1608 = shalt.err (!%p1605_p4)
}
  0x2b   :  { %s1609_s0 = scalar_lea.vmem %s44_s23, 384  ;;  %p1614_p6 = scmp.lt.s32.totalorder %s44_s23, %s44_s23 }
  0x2c   :  { %p1610_p5 = scmp.ne.s32.totalorder %s44_s23, %s1609_s0  ;;  %p1615_p7 = scmp.lt.s32.totalorder %s1609_s0, %s1609_s0 }
  0x2e   :  { %p1616_p8 = por %p1615_p7, %p1614_p6 }
  0x30   :  { %p1617_p9 = pnand %p1616_p8, %p1610_p5 }
  0x32   :  { %1620 = shalt.err (!%p1617_p9)
}
  0x33   :  { %49 = dma.hbm_to_vmem [thread:$0]  %s2016_s2, 384, %s44_s23, [#allocation7], %s1665_s30, %s1665_s30, %s1666_s6  }
  0x34   :  { %s1621_s8 = scalar_lea.vmem %s59_s20, 16  ;;  %p1626_p11 = scmp.lt.s32.totalorder %s59_s20, %s59_s20 }
  0x35   :  { %p1622_p10 = scmp.ne.s32.totalorder %s59_s20, %s1621_s8  ;;  %p1627_p12 = scmp.lt.s32.totalorder %s1621_s8, %s1621_s8 }
  0x37   :  { %p1628_p13 = por %p1627_p12, %p1626_p11 }
  0x39   :  { %p1629_p0 = pnand %p1628_p13, %p1622_p10 }
  0x3b   :  { %1632 = shalt.err (!%p1629_p0)
}
  0x3c   :  { %s1668_s9 = smov [#allocation9]  }
  0x3d   :  { %61 = dma.vmem_to_smem %s59_s20, 16, %s1668_s9, [#allocation5]  }
  0x3e   :  { %1655 = dma.done.wait [#allocation3], 512  }
  0x3f   :  { %1656 = vsyncadd [#allocation3], 4294966784 }
  0x40   :  { %1657 = dma.done.wait [#allocation7], 1408  }
  0x41   :  { %1658 = vsyncadd [#allocation7], 4294965888 }
  0x42   :  { %1659 = dma.done.wait [#allocation5], 16  }
  0x43   :  { %1660 = vsyncadd [#allocation5], 4294967280 }
  0x44   :  { %74 = sfence }
  0x45   :  { %v87_v0 = vld [vmem:[#allocation8] sm:$0xff]  ;;  %v88_v1 = vld [vmem:[#allocation8 + $0x8] sm:$0xff]  ;;  %vm90_vm0 = vcmask 162816   ;;  %v89_v4 = vld [vmem:[#allocation8 + $0x10] sm:$0xf]  ;;  %vm103_vm1 = vcmask 1043456  }
  0x46   :  { %v1466_v2 = vpack.c.bf16 %v88_v1, %v87_v0  ;;  %v1759_v3 = vld [vmem:[#allocation2] sm:$0xff]  ;;  %v1669_v5 = vmov 0.0|0.0   ;;  %vm1766_vm2 = vmpackc.low %vm90_vm0, %vm90_vm0  ;;  %v1772_v8 = vld [vmem:[#allocation6 + $0x8] sm:$0xff]  ;;  %vm1670_vm3 = vmmov 0   ;;  %v1671_v16 = vmov 0.0   ;;  %s1333_s15 = sld [smem:[#allocation9 + $0x1]] }
  0x47   :  { %1380 = vmatprep.mubr.msk.f32.mxu0 %vm90_vm0, %v1759_v3  ;;  %1470 = vmatprep.subr.bf16.mxu1 %v1669_v5  ;;  %v1770_v7 = vld [vmem:[#allocation6] sm:$0xff]  ;;  %v1776_v10 = vld [vmem:[#allocation2 + $0x8] sm:$0xff]  ;;  %v1780_v11 = vld [vmem:[#allocation2 + $0x10] sm:$0xff]  ;;  %vm512_vm4 = vcmask 130048   ;;  %vm555_vm7 = vcmask 1041409   ;;  %vm557_vm8 = vcmask 1042434  }
  0x48   :  { %1467 = vmatprep.subr.bf16.mxu0 %v1466_v2  ;;  %v1471_v9 = vpack.c.bf16 %v1772_v8, %v1770_v7  ;;  %v1783_v12 = vld [vmem:[#allocation6 + $0x10] sm:$0xff]  ;;  %v1785_v13 = vld [vmem:[#allocation6 + $0x18] sm:$0xff]  ;;  %1390 = vmatprep.mubr.msk.f32.mxu1 %vm1670_vm3, %v1671_v16  ;;  %v1809_v19 = vld [vmem:[#allocation6 + $0x20] sm:$0xff]  ;;  %vm559_vm10 = vcmask 1043459   ;;  %vm707_vm12 = vcmask 125952   ;;  %s1334_s16 = sld [smem:[#allocation9 + $0x2]] }
  0x49   :  { %1469 = vmatpush3.bf16.msra.mxu0 %v1466_v2  ;;  %v1792_v14 = vld [vmem:[#allocation2 + $0x18] sm:$0xff]  ;;  %v1475_v15 = vpack.c.bf16 %v1785_v13, %v1783_v12  ;;  %v1805_v17 = vld [vmem:[#allocation6 + $0x30] sm:$0xff]  ;;  %v1811_v20 = vld [vmem:[#allocation6 + $0x28] sm:$0xff]  ;;  %s1673_s1 = smov [#allocation10]  }
  0x4a   :  { %1378 = vmatprep.subr.msk.mxu0 %vm103_vm1, %v89_v4  ;;  %1473 = vmatpush3.bf16.xpose.msk.msra.mxu1 %vm1766_vm2, %v1471_v9  ;;  %v1807_v18 = vld [vmem:[#allocation6 + $0x38] sm:$0xff]  ;;  %v1479_v22 = vpack.c.bf16 %v1811_v20, %v1809_v19  ;;  %s1279_s17 = sshll.u32 %s1673_s1, 4  ;;  %s1280_s17 = int_to_ptr.vmem [resolvable:$true] %s1279_s17 }
  0x4b   :  { %1478 = vmatprep.subr.bf16.mxu1 %v1669_v5  ;;  %v1483_v21 = vpack.c.bf16 %v1807_v18, %v1805_v17  ;;  %s1633_s18 = scalar_lea.vmem %s1280_s17, 1536  ;;  %p1638_p2 = scmp.lt.s32.totalorder %s1280_s17, %s1280_s17 }
  0x4c   :  { %p1634_p1 = scmp.ne.s32.totalorder %s1280_s17, %s1633_s18  ;;  %p1639_p3 = scmp.lt.s32.totalorder %s1633_s18, %s1633_s18 }
  0x4d   :  { %1379 = vmatpush3.msk.msra.mxu0 %vm103_vm1, %v89_v4 }
  0x4e   :  { %1381 = vmatmul.mubr.msk.f32.vlgmr.msra.gmra.mrb[0].mxu0 %vm90_vm0, %v1776_v10  ;;  %1474 = vmatprep.subr.bf16.mxu0 %v1669_v5  ;;  %p1640_p4 = por %p1639_p3, %p1638_p2 }
  0x4f   :  { %1383 = vmatprep.mubr.msk.f32.mxu0 %vm90_vm0, %v1780_v11 }
  0x50   :  { %p1641_p5 = pnand %p1640_p4, %p1634_p1 }
  0x52   :  { %1384 = vmatmul.mubr.msk.f32.gmra.mrb[2].mxu0 %vm90_vm0, %v1792_v14 }
  0x53   :  { %1397 = vmatprep.mubr.msk.f32.mxu0 %vm1670_vm3, %v1671_v16 }
  0x54   :  { %1477 = vmatpush3.bf16.xpose.msk.msra.mxu0 %vm1766_vm2, %v1475_v15 }
  0x55   :  { %1482 = vmatprep.subr.bf16.mxu0 %v1669_v5 }
 0x121   :  { %v1382_v23 = vpop.f32.mrb[0].mxu0 }
 0x122   :  { %v173_v24 = vpop.f32.mrb[1].mxu0  ;;  %1398 = vmatmul.mubr.msk.f32.vlgmr.msra.gmra.mrb[4].mxu0 %vm90_vm0, %v1382_v23 }
 0x123   :  { %1485 = vmatpush3.bf16.xpose.msk.msra.mxu0 %vm1766_vm2, %v1483_v21  ;;  %1391 = vmatmul.mubr.msk.f32.vlgmr.msra.gmra.mrb[0].mxu1 %vm90_vm0, %v173_v24 }
 0x124   :  { %1481 = vmatpush3.bf16.xpose.msk.msra.mxu1 %vm1766_vm2, %v1479_v22  ;;  %1411 = vmatprep.mubr.msk.f32.mxu0 %vm1670_vm3, %v1671_v16 }
 0x125   :  { %v1385_v25 = vpop.f32.mrb[2].mxu0  ;;  %1404 = vmatprep.mubr.msk.f32.mxu1 %vm1670_vm3, %v1671_v16  ;;  %1486 = vmatprep.subr.bf16.mxu1 %v1669_v5 }
 0x126   :  { %v183_v26 = vpop.f32.mrb[3].mxu0  ;;  %1490 = vmatprep.subr.bf16.mxu0 %v1669_v5 }
 0x12a   :  { %1412 = vmatmul.mubr.msk.f32.vlgmr.msra.gmra.mrb[6].mxu0 %vm90_vm0, %v1385_v25 }
 0x12b   :  { %1405 = vmatmul.mubr.msk.f32.vlgmr.msra.gmra.mrb[2].mxu1 %vm90_vm0, %v183_v26  ;;  %1431 = vmatprep.mubr.msk.f32.mxu0 %vm1670_vm3, %v1671_v16 }
 0x12c   :  { %1418 = vmatprep.mubr.msk.f32.mxu1 %vm1670_vm3, %v1671_v16 }
 0x1f5   :  { %v346_v27 = vpop.f32.mrb[4].mxu0 }
 0x1f6   :  { %1515 = vtanh.f32 %v346_v27  ;;  %v267_v28 = vpop.f32.mrb[0].mxu1  ;;  %v1399_v29 = vpop.f32.mrb[5].mxu0  ;;  %v537_v27 = vlaneseq }
 0x1f7   :  { %1517 = vtanh.f32 %v267_v28  ;;  %v1392_v30 = vpop.f32.mrb[1].mxu1 }
 0x1f8   :  { %v538_v29 = vand.u32 127, %v537_v27  ;;  %v1855_v30 = vshrl.u32 %v537_v27, 7 }
 0x1fd   :  { %v504_v31 = vpop.f32.mrb[6].mxu0 }
 0x1fe   :  { %1519 = vtanh.f32 %v504_v31  ;;  %v425_v32 = vpop.f32.mrb[2].mxu1  ;;  %v1413_v33 = vpop.f32.mrb[7].mxu0 }
 0x1ff   :  { %1521 = vtanh.f32 %v425_v32  ;;  %v1406_v34 = vpop.f32.mrb[3].mxu1  ;;  %v1858_v33 = vsub.s32 %v538_v29, %v1855_v30 }
 0x200   :  { %v1516_v35 = vpop.eup %1515 }
 0x201   :  { %v1518_v36 = vpop.eup %1517  ;;  %v516_v37 = vsel %vm512_vm4, %v1516_v35, -inf }
 0x202   :  { %v513_v38 = vsel %vm512_vm4, %v1518_v36, -inf  ;;  %v673_v39 = vrot.slane %v516_v37, 4 }
 0x203   :  { %514 = vmax.xlane.f32.xlu0 %v513_v38  ;;  %v667_v40 = vrot.slane %v513_v38, 4 }
 0x204   :  { %v674_v41 = vmax.f32 %v516_v37, %v673_v39 }
 0x205   :  { %v668_v42 = vmax.f32 %v513_v38, %v667_v40 }
 0x206   :  { %v675_v43 = vrot.slane %v674_v41, 2 }
 0x207   :  { %v669_v44 = vrot.slane %v668_v42, 2  ;;  %517 = vmax.xlane.f32.xlu0 %v516_v37 }
 0x208   :  { %v1520_v45 = vpop.eup %1519  ;;  %v676_v46 = vmax.f32 %v674_v41, %v675_v43 }
 0x209   :  { %v1522_v47 = vpop.eup %1521  ;;  %v670_v48 = vmax.f32 %v668_v42, %v669_v44  ;;  %v522_v49 = vsel %vm512_vm4, %v1520_v45, -inf }
 0x20a   :  { %v677_v50 = vrot.slane %v676_v46, 1  ;;  %v519_v51 = vsel %vm512_vm4, %v1522_v47, -inf  ;;  %v685_v52 = vrot.slane %v522_v49, 4  ;;  %v1869_v47 = vsub.s32 0, %v1855_v30 }
 0x20b   :  { %v671_v53 = vrot.slane %v670_v48, 1  ;;  %520 = vmax.xlane.f32.xlu1 %v519_v51  ;;  %v679_v54 = vrot.slane %v519_v51, 4 }
 0x20c   :  { %v686_v55 = vmax.f32 %v522_v49, %v685_v52  ;;  %v678_v58 = vmax.f32 %v676_v46, %v677_v50  ;;  %v1672_v46 = vmov 0   ;;  %v581_v50 = vsub.s32 3, %v1855_v30 }
 0x20d   :  { %v680_v56 = vmax.f32 %v519_v51, %v679_v54  ;;  %v672_v57 = vmax.f32 %v670_v48, %v671_v53  ;;  %1514 = vset.pattern.permute.xlu1 %v1672_v46  ;;  %1513 = vset.pattern.permute.xlu0 %v1672_v46  ;;  %v573_v48 = vsub.s32 1, %v1855_v30 }
 0x20e   :  { %v687_v59 = vrot.slane %v686_v55, 2  ;;  %vm692_vm6 = vcmp.eq.f32.partialorder %v678_v58, 0.0 }
 0x20f   :  { %v681_v60 = vrot.slane %v680_v56, 2  ;;  %523 = vmax.xlane.f32.xlu1 %v522_v49  ;;  %vm691_vm5 = vcmp.eq.f32.partialorder %v672_v57, 0.0  ;;  %v1841_v9 = vsel %vm692_vm6, -1e+09, %v678_v58  ;;  %v577_v49 = vsub.s32 2, %v1855_v30 }
 0x210   :  { %v688_v61 = vmax.f32 %v686_v55, %v687_v59  ;;  %v1839_v4 = vsel %vm691_vm5, -1e+09, %v672_v57  ;;  %vm562_vm5 = vcmask 60416  }
 0x211   :  { %v682_v62 = vmax.f32 %v680_v56, %v681_v60  ;;  %v703_v21 = vsel %vm555_vm7, %v1841_v9, %v1839_v4 }
 0x212   :  { %v689_v63 = vrot.slane %v688_v61, 1 }
 0x213   :  { %v683_v0 = vrot.slane %v682_v62, 1 }
 0x214   :  { %v690_v1 = vmax.f32 %v688_v61, %v689_v63 }
 0x215   :  { %v684_v2 = vmax.f32 %v682_v62, %v683_v0 }
 0x216   :  { %vm694_vm9 = vcmp.eq.f32.partialorder %v690_v1, 0.0 }
 0x217   :  { %vm693_vm11 = vcmp.eq.f32.partialorder %v684_v2, 0.0  ;;  %v1848_v22 = vsel %vm694_vm9, -1e+09, %v690_v1 }
 0x218   :  { %v1843_v15 = vsel %vm693_vm11, -1e+09, %v684_v2 }
 0x219   :  { %v704_v23 = vsel %vm557_vm8, %v1843_v15, %v703_v21 }
 0x21a   :  { %v705_v24 = vsel %vm559_vm10, %v1848_v22, %v704_v23 }
 0x21b   :  { %v708_v25 = vsel %vm707_vm12, %v705_v24, -inf }
 0x21c   :  { %709 = vmax.xlane.f32.xlu1 %v708_v25 }
 0x290   :  { %v515_v26 = vpop.xlane.xlu0 %514 }
 0x291   :  { %vm525_vm14 = vcmp.eq.f32.partialorder %v515_v26, 0.0 }
 0x292   :  { %v529_v34 = vsel %vm525_vm14, -1e+09, %v515_v26 }
 0x293   :  { %v542_v39 = vrot.slane %v529_v34, %v1858_v33 }
 0x294   :  { %v518_v28 = vpop.xlane.xlu0 %517 }
 0x295   :  { %vm526_vm13 = vcmp.eq.f32.partialorder %v518_v28, 0.0 }
 0x296   :  { %v530_v31 = vsel %vm526_vm13, -1e+09, %v518_v28 }
 0x297   :  { %v546_v36 = vrot.slane %v530_v31, %v1858_v33 }
 0x298   :  { %v521_v32 = vpop.xlane.xlu1 %520 }
 0x299   :  { %vm527_vm15 = vcmp.eq.f32.partialorder %v521_v32, 0.0  ;;  %v556_v42 = vsel %vm555_vm7, %v546_v36, %v542_v39 }
 0x29a   :  { %v531_v35 = vsel %vm527_vm15, -1e+09, %v521_v32 }
 0x29b   :  { %v550_v37 = vrot.slane %v531_v35, %v1858_v33 }
 0x29c   :  { %v524_v38 = vpop.xlane.xlu1 %523 }
 0x29d   :  { %vm528_vm1 = vcmp.eq.f32.partialorder %v524_v38, 0.0  ;;  %v558_v43 = vsel %vm557_vm8, %v550_v37, %v556_v42 }
 0x29e   :  { %v532_v40 = vsel %vm528_vm1, -1e+09, %v524_v38 }
 0x29f   :  { %v554_v41 = vrot.slane %v532_v40, %v1858_v33 }
 0x2a1   :  { %v560_v44 = vsel %vm559_vm10, %v554_v41, %v558_v43 }
 0x2a2   :  { %v563_v45 = vsel %vm562_vm5, %v560_v44, -inf }
 0x2a3   :  { %564 = vmax.xlane.f32.xlu0 %v563_v45 }
 0x2a9   :  { %v710_v2 = vpop.xlane.xlu1 %709 }
 0x2aa   :  { %v712_v23 = vrot.slane %v710_v2, 1  ;;  %v713_v25 = vrot.slane %v710_v2, 2  ;;  %v714_v28 = vrot.slane %v710_v2, 3 }
 0x2ac   :  { %v720_v26 = vsub.f32 %v1841_v9, %v712_v23  ;;  %v721_v27 = vsub.f32 %v1843_v15, %v713_v25 }
 0x2ae   :  { %v725_v29 = vmul.f32 1.442695, %v720_v26  ;;  %v727_v32 = vmul.f32 1.442695, %v721_v27 }
 0x330   :  { %v565_v51 = vpop.xlane.xlu0 %564 }
 0x331   :  { %v570_v52 = vrot.slane %v565_v51, %v1869_v47  ;;  %v574_v53 = vrot.slane %v565_v51, %v573_v48  ;;  %v578_v54 = vrot.slane %v565_v51, %v577_v49  ;;  %v582_v57 = vrot.slane %v565_v51, %v581_v50 }
 0x333   :  { %v587_v55 = vsub.f32 %v529_v34, %v570_v52  ;;  %v588_v56 = vsub.f32 %v530_v31, %v574_v53  ;;  %v589_v58 = vsub.f32 %v531_v35, %v578_v54  ;;  %v590_v61 = vsub.f32 %v532_v40, %v582_v57 }
 0x334   :  { %v719_v31 = vsub.f32 %v1839_v4, %v710_v2  ;;  %v722_v34 = vsub.f32 %v1848_v22, %v714_v28 }
 0x335   :  { %v591_v59 = vmul.f32 1.442695, %v587_v55  ;;  %v593_v60 = vmul.f32 1.442695, %v588_v56  ;;  %v595_v62 = vmul.f32 1.442695, %v589_v58 }
 0x336   :  { %v597_v63 = vmul.f32 1.442695, %v590_v61  ;;  %v723_v35 = vmul.f32 1.442695, %v719_v31  ;;  %v729_v36 = vmul.f32 1.442695, %v722_v34 }
 0x337   :  { %1523 = vpow2.f32 %v591_v59 }
 0x338   :  { %1525 = vpow2.f32 %v593_v60 }
 0x339   :  { %1527 = vpow2.f32 %v595_v62 }
 0x33a   :  { %1529 = vpow2.f32 %v597_v63 }
 0x33b   :  { %1531 = vpow2.f32 %v725_v29 }
 0x33c   :  { %1533 = vpow2.f32 %v727_v32 }
 0x33d   :  { %1535 = vpow2.f32 %v723_v35 }
 0x33e   :  { %1537 = vpow2.f32 %v729_v36 }
 0x341   :  { %v1881_v0 = vpop.eup %1523 }
 0x342   :  { %v1883_v1 = vpop.eup %1525  ;;  %604 = vperm.xlu0 %1513, %v1881_v0  }
 0x343   :  { %607 = vperm.xlu1 %1514, %v1883_v1   ;;  %v1887_v21 = vpop.eup %1527 }
 0x344   :  { %v1890_v24 = vpop.eup %1529 }
 0x345   :  { %v1532_v37 = vpop.eup %1531 }
 0x346   :  { %v1534_v38 = vpop.eup %1533  ;;  %v735_v39 = vrot.slane %v1532_v37, 7 }
 0x347   :  { %610 = vperm.xlu1 %1514, %v1887_v21   ;;  %v1536_v40 = vpop.eup %1535  ;;  %v737_v9 = vrot.slane %v1534_v38, 6 }
 0x348   :  { %v736_v15 = vsel %vm555_vm7, %v735_v39, %v1536_v40  ;;  %v1538_v41 = vpop.eup %1537 }
 0x349   :  { %v738_v42 = vsel %vm557_vm8, %v737_v9, %v736_v15  ;;  %v739_v4 = vrot.slane %v1538_v41, 5 }
 0x34b   :  { %613 = vperm.xlu1 %1514, %v1890_v24   ;;  %v740_v43 = vsel %vm559_vm10, %v739_v4, %v738_v42 }
 0x34c   :  { %v742_v22 = vsel %vm707_vm12, %v740_v43, 0.0 }
 0x36f   :  { %743 = vadd.xlane.f32.xlu1 %v742_v22 }
 0x3c1   :  { %v605_v45 = vpop.permute.xlu0 %604 }
 0x3c2   :  { %v608_v44 = vpop.permute.xlu1 %607  ;;  %v618_v51 = vrot.slane %v605_v45, %v1858_v33 }
 0x3c3   :  { %v622_v52 = vrot.slane %v608_v44, %v1858_v33 }
 0x3c5   :  { %v631_v55 = vsel %vm555_vm7, %v622_v52, %v618_v51 }
 0x3c6   :  { %v611_v46 = vpop.permute.xlu1 %610 }
 0x3c7   :  { %v626_v53 = vrot.slane %v611_v46, %v1858_v33 }
 0x3c9   :  { %v632_v57 = vsel %vm557_vm8, %v626_v53, %v631_v55 }
 0x3ca   :  { %v614_v54 = vpop.permute.xlu1 %613 }
 0x3cb   :  { %v630_v56 = vrot.slane %v614_v54, %v1858_v33 }
 0x3cd   :  { %v633_v58 = vsel %vm559_vm10, %v630_v56, %v632_v57 }
 0x3ce   :  { %v635_v59 = vsel %vm562_vm5, %v633_v58, 0.0  ;;  %v1312_v58 = vld [vmem:[%s2017_s3 + $0x2] ss:$0 sm:$0xff] }
 0x3cf   :  { %636 = vadd.xlane.f32.xlu0 %v635_v59 }
 0x3fc   :  { %v744_v60 = vpop.xlane.xlu1 %743 }
 0x3fd   :  { %v746_v61 = vrot.slane %v744_v60, 1  ;;  %v747_v62 = vrot.slane %v744_v60, 2  ;;  %1539 = vrcp.f32 %v744_v60  ;;  %v748_v32 = vrot.slane %v744_v60, 3 }
 0x3ff   :  { %1541 = vrcp.f32 %v747_v62 }
 0x400   :  { %1543 = vrcp.f32 %v746_v61 }
 0x407   :  { %v1540_v63 = vpop.eup %1539 }
 0x408   :  { %v754_v2 = vmul.f32 %v1540_v63, %v1536_v40 }
 0x409   :  { %v1542_v23 = vpop.eup %1541 }
 0x40a   :  { %v788_v25 = vrot.slane %v754_v2, %v1869_v47  ;;  %v1544_v26 = vpop.eup %1543  ;;  %v758_v33 = vmul.f32 %v1542_v23, %v1534_v38 }
 0x40b   :  { %v756_v28 = vmul.f32 %v1544_v26, %v1532_v37 }
 0x40c   :  { %790 = vbcast.lane.b32.xlu1 %v788_v25, 256  ;;  %v810_v27 = vrot.slane %v758_v33, %v1869_v47 }
 0x40d   :  { %v799_v29 = vrot.slane %v756_v28, %v1869_v47 }
 0x40e   :  { %816 = vbcast.lane.b32.xlu0 %v810_v27, 264 }
 0x410   :  { %794 = vbcast.lane.b32.xlu1 %v788_v25, 264 }
 0x414   :  { %801 = vbcast.lane.b32.xlu1 %v799_v29, 256 }
 0x418   :  { %805 = vbcast.lane.b32.xlu1 %v799_v29, 264 }
 0x45c   :  { %v637_v31 = vpop.xlane.xlu0 %636 }
 0x45d   :  { %v642_v34 = vrot.slane %v637_v31, %v1869_v47  ;;  %v646_v35 = vrot.slane %v637_v31, %v573_v48  ;;  %v654_v36 = vrot.slane %v637_v31, %v581_v50  ;;  %v650_v37 = vrot.slane %v637_v31, %v577_v49 }
 0x45f   :  { %1545 = vrcp.f32 %v642_v34 }
 0x460   :  { %1547 = vrcp.f32 %v646_v35 }
 0x461   :  { %1549 = vrcp.f32 %v748_v32 }
 0x462   :  { %1551 = vrcp.f32 %v654_v36  ;;  %v1247_v36 = vstv %s1333_s15 }
 0x463   :  { %1553 = vrcp.f32 %v650_v37 }
 0x469   :  { %v1546_v38 = vpop.eup %1545 }
 0x46a   :  { %v1548_v39 = vpop.eup %1547  ;;  %v660_v40 = vmul.f32 %v1546_v38, %v1881_v0 }
 0x46b   :  { %v1550_v9 = vpop.eup %1549  ;;  %v662_v15 = vmul.f32 %v1548_v39, %v1883_v1 }
 0x46c   :  { %v1552_v42 = vpop.eup %1551  ;;  %763 = vperm.xlu1 %1514, %v660_v40   ;;  %v760_v4 = vmul.f32 %v1550_v9, %v1538_v41 }
 0x46d   :  { %768 = vperm.xlu0 %1513, %v662_v15   ;;  %v1554_v48 = vpop.eup %1553  ;;  %v666_v50 = vmul.f32 %v1552_v42, %v1890_v24  ;;  %v1249_v15 = vstv %s1334_s16 }
 0x46e   :  { %v664_v30 = vmul.f32 %v1554_v48, %v1887_v21  ;;  %v821_v49 = vrot.slane %v760_v4, %v1869_v47 }
 0x470   :  { %812 = vbcast.lane.b32.xlu1 %v810_v27, 256 }
 0x471   :  { %778 = vperm.xlu0 %1513, %v666_v50  }
 0x474   :  { %773 = vperm.xlu1 %1514, %v664_v30  }
 0x475   :  { %827 = vbcast.lane.b32.xlu0 %v821_v49, 264 }
 0x478   :  { %823 = vbcast.lane.b32.xlu1 %v821_v49, 256 }
 0x47e   :  { %v791_v0 = vpop.permute.xlu1 %790 }
 0x47f   :  { %v829_v1 = vmul.f32 %v791_v0, %v1770_v7 }
 0x480   :  { %v817_v7 = vpop.permute.xlu0 %816 }
 0x482   :  { %v795_v43 = vpop.permute.xlu1 %794 }
 0x483   :  { %v830_v22 = vmul.f32 %v795_v43, %v1772_v8  ;;  %v1310_v8 = vld [vmem:[%s2017_s3] ss:$0 sm:$0xff] }
 0x485   :  { %v1487_v44 = vpack.c.bf16 %v830_v22, %v829_v1 }
 0x486   :  { %v802_v45 = vpop.permute.xlu1 %801 }
 0x487   :  { %1489 = vmatpush3.bf16.xpose.msk.msra.mxu1 %vm1766_vm2, %v1487_v44  ;;  %v831_v21 = vmul.f32 %v802_v45, %v1783_v12 }
 0x488   :  { %1494 = vmatprep.subr.bf16.mxu1 %v1669_v5 }
 0x48a   :  { %v806_v24 = vpop.permute.xlu1 %805 }
 0x48b   :  { %v832_v47 = vmul.f32 %v806_v24, %v1785_v13  ;;  %v1311_v13 = vld [vmem:[%s2017_s3 + $0x1] ss:$0 sm:$0xff]  ;;  %s1244_s3 = sld [smem:[#allocation9]] }
 0x48d   :  { %v1491_v41 = vpack.c.bf16 %v832_v47, %v831_v21 }
 0x48f   :  { %1493 = vmatpush3.bf16.xpose.msk.msra.mxu0 %vm1766_vm2, %v1491_v41 }
 0x490   :  { %1498 = vmatprep.subr.bf16.mxu0 %v1669_v5  ;;  %v834_v5 = vmul.f32 %v817_v7, %v1811_v20 }
 0x491   :  { %v1245_v27 = vstv %s1244_s3 }
 0x4eb   :  { %v764_v46 = vpop.permute.xlu1 %763 }
 0x4ec   :  { %v769_v51 = vpop.permute.xlu0 %768  ;;  %v781_v52 = vmul.f32 %v764_v46, %v1759_v3 }
 0x4ed   :  { %v782_v53 = vmul.f32 %v769_v51, %v1776_v10 }
 0x4ee   :  { %v842_v12 = vmul.f32 %v1310_v8, %v781_v52  ;;  %v851_v3 = vmul.f32 %v1311_v13, %v781_v52  ;;  %v860_v60 = vmul.f32 %v1312_v58, %v781_v52 }
 0x4ef   :  { %v843_v54 = vmul.f32 %v1310_v8, %v782_v53  ;;  %v813_v55 = vpop.permute.xlu1 %812  ;;  %v852_v20 = vmul.f32 %v1311_v13, %v782_v53  ;;  %v861_v62 = vmul.f32 %v1312_v58, %v782_v53 }
 0x4f0   :  { %v779_v56 = vpop.permute.xlu0 %778  ;;  %v833_v57 = vmul.f32 %v813_v55, %v1809_v19  ;;  %1419 = vmatmul.mubr.msk.f32.vlgmr.msra.gmra.mrb[4].mxu1 %vm90_vm0, %v842_v12 }
 0x4f1   :  { %1432 = vmatmul.mubr.msk.f32.vlgmr.msra.gmra.mrb[8].mxu0 %vm90_vm0, %v843_v54  ;;  %1421 = vmatprep.mubr.msk.f32.mxu1 %vm1670_vm3, %v1671_v16 }
 0x4f2   :  { %v1495_v10 = vpack.c.bf16 %v834_v5, %v833_v57  ;;  %1434 = vmatprep.mubr.msk.f32.mxu0 %vm1670_vm3, %v1671_v16 }
 0x4f3   :  { %v774_v59 = vpop.permute.xlu1 %773 }
 0x4f4   :  { %1422 = vmatmul.mubr.msk.f32.gmra.mrb[6].mxu1 %vm90_vm0, %v851_v3  ;;  %v828_v19 = vpop.permute.xlu0 %827  ;;  %v783_v61 = vmul.f32 %v774_v59, %v1780_v11 }
 0x4f5   :  { %1435 = vmatmul.mubr.msk.f32.gmra.mrb[10].mxu0 %vm90_vm0, %v852_v20  ;;  %1497 = vmatpush3.bf16.xpose.msk.msra.mxu1 %vm1766_vm2, %v1495_v10  ;;  %v836_v2 = vmul.f32 %v828_v19, %v1807_v18  ;;  %v784_v18 = vmul.f32 %v779_v56, %v1792_v14 }
 0x4f6   :  { %1424 = vmatprep.mubr.msk.f32.mxu1 %vm1670_vm3, %v1671_v16  ;;  %1437 = vmatprep.mubr.msk.f32.mxu0 %vm1670_vm3, %v1671_v16  ;;  %v844_v11 = vmul.f32 %v1310_v8, %v783_v61  ;;  %v862_v33 = vmul.f32 %v1312_v58, %v783_v61 }
 0x4f7   :  { %v824_v63 = vpop.permute.xlu1 %823  ;;  %v845_v26 = vmul.f32 %v1310_v8, %v784_v18  ;;  %v854_v6 = vmul.f32 %v1311_v13, %v784_v18  ;;  %v863_v14 = vmul.f32 %v1312_v58, %v784_v18 }
 0x4f8   :  { %v835_v23 = vmul.f32 %v824_v63, %v1805_v17  ;;  %1425 = vmatmul.mubr.msk.f32.gmra.mrb[8].mxu1 %vm90_vm0, %v860_v60  ;;  %v853_v17 = vmul.f32 %v1311_v13, %v783_v61 }
 0x4f9   :  { %1438 = vmatmul.mubr.msk.f32.gmra.mrb[12].mxu0 %vm90_vm0, %v861_v62  ;;  %1444 = vmatprep.mubr.msk.f32.mxu1 %vm1670_vm3, %v1671_v16 }
 0x4fa   :  { %v1499_v25 = vpack.c.bf16 %v836_v2, %v835_v23  ;;  %1457 = vmatprep.mubr.msk.f32.mxu0 %vm1670_vm3, %v1671_v16 }
 0x4fc   :  { %1445 = vmatmul.mubr.msk.f32.vlgmr.msra.gmra.mrb[10].mxu1 %vm90_vm0, %v844_v11  ;;  %1501 = vmatpush3.bf16.xpose.msk.msra.mxu0 %vm1766_vm2, %v1499_v25 }
 0x4fd   :  { %1447 = vmatprep.mubr.msk.f32.mxu1 %vm1670_vm3, %v1671_v16 }
 0x500   :  { %1448 = vmatmul.mubr.msk.f32.gmra.mrb[12].mxu1 %vm90_vm0, %v853_v17 }
 0x501   :  { %1450 = vmatprep.mubr.msk.f32.mxu1 %vm1670_vm3, %v1671_v16 }
 0x503   :  { %1458 = vmatmul.mubr.msk.f32.vlgmr.msra.gmra.mrb[14].mxu0 %vm90_vm0, %v845_v26 }
 0x504   :  { %1451 = vmatmul.mubr.msk.f32.gmra.mrb[14].mxu1 %vm90_vm0, %v862_v33  ;;  %1460 = vmatprep.mubr.msk.f32.mxu0 %vm1670_vm3, %v1671_v16 }
 0x507   :  { %1461 = vmatmul.mubr.msk.f32.gmra.mrb[16].mxu0 %vm90_vm0, %v854_v6 }
 0x508   :  { %1463 = vmatprep.mubr.msk.f32.mxu0 %vm1670_vm3, %v1671_v16 }
 0x50b   :  { %1464 = vmatmul.mubr.msk.f32.gmra.mrb[18].mxu0 %vm90_vm0, %v863_v14 }
 0x5c3   :  { %v945_v28 = vpop.f32.mrb[4].mxu1 }
 0x5c4   :  { %v1250_v29 = vadd.f32 %v1245_v27, %v945_v28  ;;  %v1040_v31 = vpop.f32.mrb[8].mxu0  ;;  %v1420_v32 = vpop.f32.mrb[5].mxu1 }
 0x5c5   :  { %v1253_v34 = vadd.f32 %v1245_v27, %v1040_v31  ;;  %v1433_v35 = vpop.f32.mrb[9].mxu0 }
 0x5c6   :  { %1262 = vst.msk [vmem:[#allocation10] sm:$0xff] %vm512_vm4, %v1250_v29 }
 0x5c7   :  { %1265 = vst.msk [vmem:[#allocation10 + $0x18] sm:$0xff] %vm512_vm4, %v1253_v34  ;;  %v950_v37 = vpop.f32.mrb[6].mxu1 }
 0x5c8   :  { %v1251_v16 = vadd.f32 %v1247_v36, %v950_v37  ;;  %v1045_v38 = vpop.f32.mrb[10].mxu0  ;;  %v1423_v39 = vpop.f32.mrb[7].mxu1 }
 0x5c9   :  { %v1254_v40 = vadd.f32 %v1247_v36, %v1045_v38  ;;  %v1436_v9 = vpop.f32.mrb[11].mxu0 }
 0x5ca   :  { %1263 = vst.msk [vmem:[#allocation10 + $0x8] sm:$0xff] %vm512_vm4, %v1251_v16 }
 0x5cb   :  { %1266 = vst.msk [vmem:[#allocation10 + $0x20] sm:$0xff] %vm512_vm4, %v1254_v40  ;;  %v955_v42 = vpop.f32.mrb[8].mxu1 }
 0x5cc   :  { %v1252_v48 = vadd.f32 %v1249_v15, %v955_v42  ;;  %v1050_v50 = vpop.f32.mrb[12].mxu0  ;;  %v1426_v4 = vpop.f32.mrb[9].mxu1 }
 0x5cd   :  { %v1255_v30 = vadd.f32 %v1249_v15, %v1050_v50  ;;  %v1439_v49 = vpop.f32.mrb[13].mxu0 }
 0x5ce   :  { %1264 = vst.msk [vmem:[#allocation10 + $0x10] sm:$0xff] %vm512_vm4, %v1252_v48 }
 0x5cf   :  { %1267 = vst.msk [vmem:[#allocation10 + $0x28] sm:$0xff] %vm512_vm4, %v1255_v30  ;;  %v1135_v0 = vpop.f32.mrb[10].mxu1 }
 0x5d0   :  { %v1256_v43 = vadd.f32 %v1245_v27, %v1135_v0  ;;  %v1446_v1 = vpop.f32.mrb[11].mxu1 }
 0x5d2   :  { %1268 = vst.msk [vmem:[#allocation10 + $0x30] sm:$0xff] %vm512_vm4, %v1256_v43 }
 0x5d3   :  { %v1140_v22 = vpop.f32.mrb[12].mxu1 }
 0x5d4   :  { %v1257_v44 = vadd.f32 %v1247_v36, %v1140_v22  ;;  %v1449_v45 = vpop.f32.mrb[13].mxu1 }
 0x5d6   :  { %1269 = vst.msk [vmem:[#allocation10 + $0x38] sm:$0xff] %vm512_vm4, %v1257_v44  ;;  %v1230_v24 = vpop.f32.mrb[14].mxu0 }
 0x5d7   :  { %v1259_v21 = vadd.f32 %v1245_v27, %v1230_v24  ;;  %v1145_v47 = vpop.f32.mrb[14].mxu1  ;;  %v1459_v41 = vpop.f32.mrb[15].mxu0 }
 0x5d8   :  { %v1258_v7 = vadd.f32 %v1249_v15, %v1145_v47  ;;  %v1452_v8 = vpop.f32.mrb[15].mxu1 }
 0x5d9   :  { %1271 = vst.msk [vmem:[#allocation10 + $0x48] sm:$0xff] %vm512_vm4, %v1259_v21 }
 0x5da   :  { %1270 = vst.msk [vmem:[#allocation10 + $0x40] sm:$0xff] %vm512_vm4, %v1258_v7  ;;  %v1235_v46 = vpop.f32.mrb[16].mxu0 }
 0x5db   :  { %v1260_v51 = vadd.f32 %v1247_v36, %v1235_v46  ;;  %v1462_v52 = vpop.f32.mrb[17].mxu0 }
 0x5dd   :  { %1272 = vst.msk [vmem:[#allocation10 + $0x50] sm:$0xff] %vm512_vm4, %v1260_v51 }
 0x5de   :  { %v1240_v53 = vpop.f32.mrb[18].mxu0 }
 0x5df   :  { %v1261_v12 = vadd.f32 %v1249_v15, %v1240_v53  ;;  %v1465_v13 = vpop.f32.mrb[19].mxu0 }
 0x5e1   :  { %1273 = vst.msk [vmem:[#allocation10 + $0x58] sm:$0xff] %vm512_vm4, %v1261_v12 }
 0x5e2   :  { %1644 = shalt.err (!%p1641_p5)
}
 0x5e3   :  { %s1645_s22 = scalar_lea.hbm %s2019_s5, 1536 }
 0x5e4   :  { %p1646_p6 = scmp.ne.s32.totalorder %s2019_s5, %s1645_s22  ;;  %p1649_p7 = scmp.lt.u32.totalorder %s1645_s22, %s2019_s5 }
 0x5e6   :  { %p1651_p8 = pnand %p1649_p7, %p1646_p6 }
 0x5e8   :  { %1654 = shalt.err (!%p1651_p8)
}
 0x5e9   :  { %1285 = dma.vmem_to_hbm [thread:$0]  %s1280_s17, 1536, %s2019_s5, [#allocation4], %s1665_s30, %s1665_s30, %s1666_s6  }
 0x5ea   :  { %1661 = dma.done.wait [#allocation4], 1536  }
 0x5eb   :  { %1662 = vsyncadd [#allocation4], 4294965760 }
 0x5ec   :  { %1289 = vsyncpa [#allocation3], 1 }
 0x5ed   :  { %1290 = vsyncpa [#allocation7], 1 }
 0x5ee   :  { %1291 = vsyncpa [#allocation4], 1 }
 0x5ef   :  { %1292 = vsyncpa [#allocation5], 1 }

</bundles_post_ra>
